<compile_context>
chip_gen: v7x
topology: tpu7x:2x2x1
jax: 0.10.0
libtpu: 0.0.40
codegen_flags: <defaults>
</compile_context>

<pallas_src>
import functools

import jax
import jax.numpy as jnp
from jax import lax
from jax.experimental import pallas as pl
from jax.experimental.pallas import tpu as pltpu


def _conv_bn_relu_kernel(x_ref, w_ref, b_ref, o_ref, *, taps, M, Wph, Ho, Wo,
                         concat):
    """One image: 3x3 conv (BN folded) + bias + ReLU, fused crop/stride store.

    x_ref: (1, s*s, Ck, Lph)   phase-decomposed, flattened, zero-tailed input
    w_ref: (Cout, 9*Ck) if concat else (9, Cout, Ck)   folded conv+BN weights
    b_ref: (Cout, 1)           folded BN bias (f32)
    o_ref: (1, Cout, Ho, Wo)   final NCHW output block
    taps:  9 static (phase_index, flat_offset) pairs, tap-major (ky*3+kx)
    """
    if concat:
        # Shallow layers: one MXU pass with K = 9*Ck (good systolic fill).
        xall = jnp.concatenate(
            [x_ref[0, q, :, pl.ds(off, M)] for q, off in taps], axis=0)
        acc = jnp.dot(w_ref[...], xall, preferred_element_type=jnp.float32)
    else:
        # Deep layers: 9 accumulated dots, no (9*Ck, M) buffer materialized.
        q0, off0 = taps[0]
        acc = jnp.dot(w_ref[0], x_ref[0, q0, :, pl.ds(off0, M)],
                      preferred_element_type=jnp.float32)
        for t in range(1, 9):
            q, off = taps[t]
            acc = acc + jnp.dot(w_ref[t], x_ref[0, q, :, pl.ds(off, M)],
                                preferred_element_type=jnp.float32)

    y = jnp.maximum(acc + b_ref[...], 0.0).astype(o_ref.dtype)     # (Cout, M)

    # Fused crop: keep only the Wo valid columns of each of the Ho wide rows.
    for r in range(Ho):
        o_ref[0, :, r, :] = y[:, r * Wph:r * Wph + Wo]


def custom_conv(x, w, gamma, beta, mean, var, *, stride=1, padding=0,
                eps=1e-5):
    """Forward of Custom_Conv: 3x3 conv (no bias) -> eval-mode BN -> ReLU.

    x: (N, Cin, H, W) NCHW; w: (Cout, Cin, 3, 3) (PyTorch layouts).
    Returns (N, Cout, Ho, Wo) NCHW in float32.
    """
    N, Cin, H, W = x.shape
    Cout, Cin_w, KH, KW = w.shape
    assert (Cin_w, KH, KW) == (Cin, 3, 3), "only 3x3 kernels supported"
    s = int(stride)
    assert s >= 1

    Hp, Wp = H + 2 * padding, W + 2 * padding
    Ho, Wo = (Hp - 3) // s + 1, (Wp - 3) // s + 1
    assert Ho >= 1 and Wo >= 1

    # ---- fold eval-mode BatchNorm into the bias-free conv (f32 math) -------
    scale = gamma / jnp.sqrt(var + eps)                    # (Cout,)
    w_eff = w * scale[:, None, None, None]                 # (Cout, Cin, 3, 3)
    b_eff = (beta - mean * scale).reshape(Cout, 1).astype(jnp.float32)

    # Matmul structure per layer depth:
    #   shallow (9*Cin_pad <= 256): concat 9 taps -> one dot, K close to 256.
    #   deep:   9 accumulated dots, K = Cin (no 9x xall buffer, no chan pad).
    Cin_pad = -(-Cin // 8) * 8
    concat = 9 * Cin_pad <= 256
    Ck = Cin_pad if concat else Cin

    # Phase (space-to-depth) decomposition absorbs the conv stride so every
    # tap is a contiguous flat slice of a phase grid; extra phase row = tail.
    Hph, Wph = -(-Hp // s), -(-Wp // s)
    Hs, Ws = s * (Hph + 1), s * Wph
    Lph = (Hph + 1) * Wph                 # flat length per phase (with tail)
    M = Ho * Wph                          # dense "wide" output length

    # ---- single pad: channel + conv + phase/tail padding in one pass -------
    xq = jnp.pad(x.astype(jnp.bfloat16),
                 ((0, 0), (0, Ck - Cin),
                  (padding, Hs - H - padding),
                  (padding, Ws - W - padding)))            # (N, Ck, Hs, Ws)
    xq = xq.reshape(N, Ck, Hph + 1, s, Wph, s)
    xq = jnp.transpose(xq, (0, 3, 5, 1, 2, 4))     # (N, s, s, Ck, Hph+1, Wph)
    xf = xq.reshape(N, s * s, Ck, Lph)

    # Static tap table: tap t = ky*3+kx reads phase (ky%s, kx%s) at offset
    # (ky//s)*Wph + kx//s.
    taps = tuple(((ky % s) * s + (kx % s), (ky // s) * Wph + (kx // s))
                 for ky in range(3) for kx in range(3))

    if concat:
        wt = jnp.transpose(w_eff, (0, 2, 3, 1))            # (Cout, 3, 3, Cin)
        wt = jnp.pad(wt, ((0, 0), (0, 0), (0, 0), (0, Ck - Cin)))
        w_all = wt.reshape(Cout, 9 * Ck).astype(jnp.bfloat16)
        w_spec = pl.BlockSpec((Cout, 9 * Ck), lambda n: (0, 0))
    else:
        w_all = jnp.transpose(w_eff, (2, 3, 0, 1)).reshape(9, Cout, Cin)
        w_all = w_all.astype(jnp.bfloat16)
        w_spec = pl.BlockSpec((9, Cout, Cin), lambda n: (0, 0, 0))

    kernel = functools.partial(_conv_bn_relu_kernel, taps=taps, M=M, Wph=Wph,
                               Ho=Ho, Wo=Wo, concat=concat)

    # VMEM budget from actual block bytes (double-buffered blocks + in-kernel
    # intermediates), clamped to sane scoped limits.
    est = (2 * (s * s * Ck * Lph * 2)            # x block (bf16), 2 buffers
           + 2 * int(w_all.size) * 2             # weights (bf16)
           + 2 * Cout * 4                        # bias (f32)
           + 2 * (Cout * Ho * Wo * 4)            # out block (f32), 2 buffers
           + (9 * Ck * M * 2 if concat else 0)   # xall (bf16), concat path
           + 2 * Cout * M * 4)                   # acc / relu temps (f32)
    vmem_limit = int(min(100 * 2**20, max(32 * 2**20, 2 * est)))

    return pl.pallas_call(
        kernel,
        out_shape=jax.ShapeDtypeStruct((N, Cout, Ho, Wo), jnp.float32),
        grid=(N,),
        in_specs=[
            pl.BlockSpec((1, s * s, Ck, Lph), lambda n: (n, 0, 0, 0)),   # x
            w_spec,                                                      # w
            pl.BlockSpec((Cout, 1), lambda n: (0, 0)),                   # bias
        ],
        out_specs=pl.BlockSpec((1, Cout, Ho, Wo), lambda n: (n, 0, 0, 0)),
        compiler_params=pltpu.CompilerParams(
            dimension_semantics=("parallel",),
            vmem_limit_bytes=vmem_limit),
    )(xf, w_all, b_eff)


def reference(x, w, gamma, beta, mean, var, *, stride=1, padding=0, eps=1e-5):
    """Pure-JAX f32 reference: conv (no bias) -> eval-mode BN -> ReLU."""
    conv = lax.conv_general_dilated(
        x, w, window_strides=(stride, stride),
        padding=[(padding, padding), (padding, padding)],
        dimension_numbers=("NCHW", "OIHW", "NCHW"),
        precision=lax.Precision.HIGHEST)
    inv = (gamma / jnp.sqrt(var + eps))[None, :, None, None]
    bn = (conv - mean[None, :, None, None]) * inv + beta[None, :, None, None]
    return jnp.maximum(bn, 0.0)


if __name__ == "__main__":
    key = jax.random.PRNGKey(0)

    def make_inputs(k, N, Cin, Cout, H, W):
        ks = jax.random.split(k, 6)
        x = jax.random.normal(ks[0], (N, Cin, H, W), jnp.float32)
        w = jax.random.normal(ks[1], (Cout, Cin, 3, 3), jnp.float32) * 0.1
        gamma = 0.5 + jax.random.uniform(ks[2], (Cout,), jnp.float32)
        beta = jax.random.normal(ks[3], (Cout,), jnp.float32) * 0.1
        mean = jax.random.normal(ks[4], (Cout,), jnp.float32) * 0.1
        var = 0.5 + jax.random.uniform(ks[5], (Cout,), jnp.float32)
        return x, w, gamma, beta, mean, var

    # bf16 operands (f32 accumulation) => tolerance loosened vs the f32 ref.
    TOL = dict(atol=5e-2, rtol=5e-2)

    configs = [
        # (name,           N, Cin, Cout,  H,  W, stride, padding)
        ("stride1_pad0",   2,   4,    8, 16, 16, 1, 0),   # module defaults
        ("stride2_pad1",   2,   4,    8, 16, 16, 2, 1),   # ContextNet stem cfg
        ("deep_stride2",   2,  40,   16, 12, 12, 2, 1),   # per-tap-accum path
    ]

    k0 = key
    for name, N, Cin, Cout, H, W, s, p in configs:
        k0, kc = jax.random.split(k0)
        x, w, gamma, beta, mean, var = make_inputs(kc, N, Cin, Cout, H, W)
        out = jax.block_until_ready(
            custom_conv(x, w, gamma, beta, mean, var, stride=s, padding=p))
        ref = reference(x, w, gamma, beta, mean, var, stride=s, padding=p)
        assert out.shape == ref.shape, (name, out.shape, ref.shape)
        if not jnp.allclose(out, ref, **TOL):
            raise AssertionError(
                f"{name}: mismatch, max abs err = "
                f"{jnp.max(jnp.abs(out - ref))}")

    print("KERNEL_OK")
</pallas_src>

<mosaic_0001>
module attributes {stable_mosaic.version = 11 : i64} {
  func.func @_conv_bn_relu_kernel(%arg0: i32, %arg1: memref<1x1x8x272xbf16, #tpu.memory_space<vmem>>, %arg2: memref<8x72xbf16, #tpu.memory_space<vmem>>, %arg3: memref<8x1xf32, #tpu.memory_space<vmem>>, %arg4: memref<1x8x14x14xf32, #tpu.memory_space<vmem>>) attributes {dimension_semantics = [#tpu.dimension_semantics<parallel>], iteration_bounds = array<i64: 2>, scalar_prefetch = 0 : i64, scratch_operands = 0 : i64, tpu.core_type = #tpu.core_type<tc>, window_params = [{transform_indices = @transform_0, window_bounds = array<i64: 1, 1, 8, 272>}, {pipeline_mode = #tpu.pipeline_mode<synchronous>, transform_indices = @transform_1, window_bounds = array<i64: 8, 72>}, {pipeline_mode = #tpu.pipeline_mode<synchronous>, transform_indices = @transform_2, window_bounds = array<i64: 8, 1>}, {transform_indices = @transform_3, window_bounds = array<i64: 1, 8, 14, 14>}]} {
    %c0 = arith.constant 0 : index
    %c0_0 = arith.constant 0 : index
    %c0_1 = arith.constant 0 : index
    %c0_2 = arith.constant 0 : index
    %0 = vector.load %arg1[%c0, %c0_0, %c0_1, %c0_2] : memref<1x1x8x272xbf16, #tpu.memory_space<vmem>>, vector<1x1x8x224xbf16>
    %1 = vector.shape_cast %0 : vector<1x1x8x224xbf16> to vector<8x224xbf16>
    %c0_3 = arith.constant 0 : index
    %c0_4 = arith.constant 0 : index
    %c0_5 = arith.constant 0 : index
    %c1 = arith.constant 1 : index
    %2 = vector.load %arg1[%c0_3, %c0_4, %c0_5, %c1] : memref<1x1x8x272xbf16, #tpu.memory_space<vmem>>, vector<1x1x8x224xbf16>
    %3 = vector.shape_cast %2 : vector<1x1x8x224xbf16> to vector<8x224xbf16>
    %c0_6 = arith.constant 0 : index
    %c0_7 = arith.constant 0 : index
    %c0_8 = arith.constant 0 : index
    %c2 = arith.constant 2 : index
    %4 = vector.load %arg1[%c0_6, %c0_7, %c0_8, %c2] : memref<1x1x8x272xbf16, #tpu.memory_space<vmem>>, vector<1x1x8x224xbf16>
    %5 = vector.shape_cast %4 : vector<1x1x8x224xbf16> to vector<8x224xbf16>
    %c0_9 = arith.constant 0 : index
    %c0_10 = arith.constant 0 : index
    %c0_11 = arith.constant 0 : index
    %c16 = arith.constant 16 : index
    %6 = vector.load %arg1[%c0_9, %c0_10, %c0_11, %c16] : memref<1x1x8x272xbf16, #tpu.memory_space<vmem>>, vector<1x1x8x224xbf16>
    %7 = vector.shape_cast %6 : vector<1x1x8x224xbf16> to vector<8x224xbf16>
    %c0_12 = arith.constant 0 : index
    %c0_13 = arith.constant 0 : index
    %c0_14 = arith.constant 0 : index
    %c17 = arith.constant 17 : index
    %8 = vector.load %arg1[%c0_12, %c0_13, %c0_14, %c17] : memref<1x1x8x272xbf16, #tpu.memory_space<vmem>>, vector<1x1x8x224xbf16>
    %9 = vector.shape_cast %8 : vector<1x1x8x224xbf16> to vector<8x224xbf16>
    %c0_15 = arith.constant 0 : index
    %c0_16 = arith.constant 0 : index
    %c0_17 = arith.constant 0 : index
    %c18 = arith.constant 18 : index
    %10 = vector.load %arg1[%c0_15, %c0_16, %c0_17, %c18] : memref<1x1x8x272xbf16, #tpu.memory_space<vmem>>, vector<1x1x8x224xbf16>
    %11 = vector.shape_cast %10 : vector<1x1x8x224xbf16> to vector<8x224xbf16>
    %c0_18 = arith.constant 0 : index
    %c0_19 = arith.constant 0 : index
    %c0_20 = arith.constant 0 : index
    %c32 = arith.constant 32 : index
    %12 = vector.load %arg1[%c0_18, %c0_19, %c0_20, %c32] : memref<1x1x8x272xbf16, #tpu.memory_space<vmem>>, vector<1x1x8x224xbf16>
    %13 = vector.shape_cast %12 : vector<1x1x8x224xbf16> to vector<8x224xbf16>
    %c0_21 = arith.constant 0 : index
    %c0_22 = arith.constant 0 : index
    %c0_23 = arith.constant 0 : index
    %c33 = arith.constant 33 : index
    %14 = vector.load %arg1[%c0_21, %c0_22, %c0_23, %c33] : memref<1x1x8x272xbf16, #tpu.memory_space<vmem>>, vector<1x1x8x224xbf16>
    %15 = vector.shape_cast %14 : vector<1x1x8x224xbf16> to vector<8x224xbf16>
    %c0_24 = arith.constant 0 : index
    %c0_25 = arith.constant 0 : index
    %c0_26 = arith.constant 0 : index
    %c34 = arith.constant 34 : index
    %16 = vector.load %arg1[%c0_24, %c0_25, %c0_26, %c34] : memref<1x1x8x272xbf16, #tpu.memory_space<vmem>>, vector<1x1x8x224xbf16>
    %17 = vector.shape_cast %16 : vector<1x1x8x224xbf16> to vector<8x224xbf16>
    %18 = tpu.concatenate %1, %3, %5, %7, %9, %11, %13, %15, %17 in 0 : vector<8x224xbf16>, vector<8x224xbf16>, vector<8x224xbf16>, vector<8x224xbf16>, vector<8x224xbf16>, vector<8x224xbf16>, vector<8x224xbf16>, vector<8x224xbf16>, vector<8x224xbf16> -> vector<72x224xbf16>
    %c0_27 = arith.constant 0 : index
    %c0_28 = arith.constant 0 : index
    %19 = vector.load %arg2[%c0_27, %c0_28] : memref<8x72xbf16, #tpu.memory_space<vmem>>, vector<8x72xbf16>
    %cst = arith.constant dense<0.000000e+00> : vector<8x224xf32>
    %20 = tpu.matmul %19, %18, %cst {dimension_numbers = #tpu.dot_dimension_numbers<[1], [0], [0], [1], [0, 0, 1, 1], [], []>} : vector<8x72xbf16>, vector<72x224xbf16>, vector<8x224xf32> -> vector<8x224xf32>
    %c0_29 = arith.constant 0 : index
    %c0_30 = arith.constant 0 : index
    %21 = vector.load %arg3[%c0_29, %c0_30] : memref<8x1xf32, #tpu.memory_space<vmem>>, vector<8x1xf32>
    %22 = vector.broadcast %21 : vector<8x1xf32> to vector<8x224xf32>
    %23 = arith.addf %20, %22 : vector<8x224xf32>
    %cst_31 = arith.constant 0.000000e+00 : f32
    %24 = vector.broadcast %cst_31 : f32 to vector<8x224xf32>
    %25 = arith.maximumf %23, %24 : vector<8x224xf32>
    %26 = vector.extract_strided_slice %25 {offsets = [0, 0], sizes = [8, 14], strides = [1, 1]} : vector<8x224xf32> to vector<8x14xf32>
    %c0_32 = arith.constant 0 : index
    %c0_33 = arith.constant 0 : index
    %c0_34 = arith.constant 0 : index
    %c0_35 = arith.constant 0 : index
    %27 = vector.load %arg4[%c0_32, %c0_33, %c0_34, %c0_35] : memref<1x8x14x14xf32, #tpu.memory_space<vmem>>, vector<1x8x1x14xf32>
    %28 = vector.shape_cast %27 : vector<1x8x1x14xf32> to vector<8x14xf32>
    %29 = vector.shape_cast %26 : vector<8x14xf32> to vector<1x8x1x14xf32>
    tpu.vector_store %arg4[%c0_32, %c0_33, %c0_34, %c0_35], %29 {strides = array<i32>} : memref<1x8x14x14xf32, #tpu.memory_space<vmem>>, vector<1x8x1x14xf32>,
    %30 = vector.extract_strided_slice %25 {offsets = [0, 16], sizes = [8, 14], strides = [1, 1]} : vector<8x224xf32> to vector<8x14xf32>
    %c0_36 = arith.constant 0 : index
    %c0_37 = arith.constant 0 : index
    %c1_38 = arith.constant 1 : index
    %c0_39 = arith.constant 0 : index
    %31 = vector.load %arg4[%c0_36, %c0_37, %c1_38, %c0_39] : memref<1x8x14x14xf32, #tpu.memory_space<vmem>>, vector<1x8x1x14xf32>
    %32 = vector.shape_cast %31 : vector<1x8x1x14xf32> to vector<8x14xf32>
    %33 = vector.shape_cast %30 : vector<8x14xf32> to vector<1x8x1x14xf32>
    tpu.vector_store %arg4[%c0_36, %c0_37, %c1_38, %c0_39], %33 {strides = array<i32>} : memref<1x8x14x14xf32, #tpu.memory_space<vmem>>, vector<1x8x1x14xf32>,
    %34 = vector.extract_strided_slice %25 {offsets = [0, 32], sizes = [8, 14], strides = [1, 1]} : vector<8x224xf32> to vector<8x14xf32>
    %c0_40 = arith.constant 0 : index
    %c0_41 = arith.constant 0 : index
    %c2_42 = arith.constant 2 : index
    %c0_43 = arith.constant 0 : index
    %35 = vector.load %arg4[%c0_40, %c0_41, %c2_42, %c0_43] : memref<1x8x14x14xf32, #tpu.memory_space<vmem>>, vector<1x8x1x14xf32>
    %36 = vector.shape_cast %35 : vector<1x8x1x14xf32> to vector<8x14xf32>
    %37 = vector.shape_cast %34 : vector<8x14xf32> to vector<1x8x1x14xf32>
    tpu.vector_store %arg4[%c0_40, %c0_41, %c2_42, %c0_43], %37 {strides = array<i32>} : memref<1x8x14x14xf32, #tpu.memory_space<vmem>>, vector<1x8x1x14xf32>,
    %38 = vector.extract_strided_slice %25 {offsets = [0, 48], sizes = [8, 14], strides = [1, 1]} : vector<8x224xf32> to vector<8x14xf32>
    %c0_44 = arith.constant 0 : index
    %c0_45 = arith.constant 0 : index
    %c3 = arith.constant 3 : index
    %c0_46 = arith.constant 0 : index
    %39 = vector.load %arg4[%c0_44, %c0_45, %c3, %c0_46] : memref<1x8x14x14xf32, #tpu.memory_space<vmem>>, vector<1x8x1x14xf32>
    %40 = vector.shape_cast %39 : vector<1x8x1x14xf32> to vector<8x14xf32>
    %41 = vector.shape_cast %38 : vector<8x14xf32> to vector<1x8x1x14xf32>
    tpu.vector_store %arg4[%c0_44, %c0_45, %c3, %c0_46], %41 {strides = array<i32>} : memref<1x8x14x14xf32, #tpu.memory_space<vmem>>, vector<1x8x1x14xf32>,
    %42 = vector.extract_strided_slice %25 {offsets = [0, 64], sizes = [8, 14], strides = [1, 1]} : vector<8x224xf32> to vector<8x14xf32>
    %c0_47 = arith.constant 0 : index
    %c0_48 = arith.constant 0 : index
    %c4 = arith.constant 4 : index
    %c0_49 = arith.constant 0 : index
    %43 = vector.load %arg4[%c0_47, %c0_48, %c4, %c0_49] : memref<1x8x14x14xf32, #tpu.memory_space<vmem>>, vector<1x8x1x14xf32>
    %44 = vector.shape_cast %43 : vector<1x8x1x14xf32> to vector<8x14xf32>
    %45 = vector.shape_cast %42 : vector<8x14xf32> to vector<1x8x1x14xf32>
    tpu.vector_store %arg4[%c0_47, %c0_48, %c4, %c0_49], %45 {strides = array<i32>} : memref<1x8x14x14xf32, #tpu.memory_space<vmem>>, vector<1x8x1x14xf32>,
    %46 = vector.extract_strided_slice %25 {offsets = [0, 80], sizes = [8, 14], strides = [1, 1]} : vector<8x224xf32> to vector<8x14xf32>
    %c0_50 = arith.constant 0 : index
    %c0_51 = arith.constant 0 : index
    %c5 = arith.constant 5 : index
    %c0_52 = arith.constant 0 : index
    %47 = vector.load %arg4[%c0_50, %c0_51, %c5, %c0_52] : memref<1x8x14x14xf32, #tpu.memory_space<vmem>>, vector<1x8x1x14xf32>
    %48 = vector.shape_cast %47 : vector<1x8x1x14xf32> to vector<8x14xf32>
    %49 = vector.shape_cast %46 : vector<8x14xf32> to vector<1x8x1x14xf32>
    tpu.vector_store %arg4[%c0_50, %c0_51, %c5, %c0_52], %49 {strides = array<i32>} : memref<1x8x14x14xf32, #tpu.memory_space<vmem>>, vector<1x8x1x14xf32>,
    %50 = vector.extract_strided_slice %25 {offsets = [0, 96], sizes = [8, 14], strides = [1, 1]} : vector<8x224xf32> to vector<8x14xf32>
    %c0_53 = arith.constant 0 : index
    %c0_54 = arith.constant 0 : index
    %c6 = arith.constant 6 : index
    %c0_55 = arith.constant 0 : index
    %51 = vector.load %arg4[%c0_53, %c0_54, %c6, %c0_55] : memref<1x8x14x14xf32, #tpu.memory_space<vmem>>, vector<1x8x1x14xf32>
    %52 = vector.shape_cast %51 : vector<1x8x1x14xf32> to vector<8x14xf32>
    %53 = vector.shape_cast %50 : vector<8x14xf32> to vector<1x8x1x14xf32>
    tpu.vector_store %arg4[%c0_53, %c0_54, %c6, %c0_55], %53 {strides = array<i32>} : memref<1x8x14x14xf32, #tpu.memory_space<vmem>>, vector<1x8x1x14xf32>,
    %54 = vector.extract_strided_slice %25 {offsets = [0, 112], sizes = [8, 14], strides = [1, 1]} : vector<8x224xf32> to vector<8x14xf32>
    %c0_56 = arith.constant 0 : index
    %c0_57 = arith.constant 0 : index
    %c7 = arith.constant 7 : index
    %c0_58 = arith.constant 0 : index
    %55 = vector.load %arg4[%c0_56, %c0_57, %c7, %c0_58] : memref<1x8x14x14xf32, #tpu.memory_space<vmem>>, vector<1x8x1x14xf32>
    %56 = vector.shape_cast %55 : vector<1x8x1x14xf32> to vector<8x14xf32>
    %57 = vector.shape_cast %54 : vector<8x14xf32> to vector<1x8x1x14xf32>
    tpu.vector_store %arg4[%c0_56, %c0_57, %c7, %c0_58], %57 {strides = array<i32>} : memref<1x8x14x14xf32, #tpu.memory_space<vmem>>, vector<1x8x1x14xf32>,
    %58 = vector.extract_strided_slice %25 {offsets = [0, 128], sizes = [8, 14], strides = [1, 1]} : vector<8x224xf32> to vector<8x14xf32>
    %c0_59 = arith.constant 0 : index
    %c0_60 = arith.constant 0 : index
    %c8 = arith.constant 8 : index
    %c0_61 = arith.constant 0 : index
    %59 = vector.load %arg4[%c0_59, %c0_60, %c8, %c0_61] : memref<1x8x14x14xf32, #tpu.memory_space<vmem>>, vector<1x8x1x14xf32>
    %60 = vector.shape_cast %59 : vector<1x8x1x14xf32> to vector<8x14xf32>
    %61 = vector.shape_cast %58 : vector<8x14xf32> to vector<1x8x1x14xf32>
    tpu.vector_store %arg4[%c0_59, %c0_60, %c8, %c0_61], %61 {strides = array<i32>} : memref<1x8x14x14xf32, #tpu.memory_space<vmem>>, vector<1x8x1x14xf32>,
    %62 = vector.extract_strided_slice %25 {offsets = [0, 144], sizes = [8, 14], strides = [1, 1]} : vector<8x224xf32> to vector<8x14xf32>
    %c0_62 = arith.constant 0 : index
    %c0_63 = arith.constant 0 : index
    %c9 = arith.constant 9 : index
    %c0_64 = arith.constant 0 : index
    %63 = vector.load %arg4[%c0_62, %c0_63, %c9, %c0_64] : memref<1x8x14x14xf32, #tpu.memory_space<vmem>>, vector<1x8x1x14xf32>
    %64 = vector.shape_cast %63 : vector<1x8x1x14xf32> to vector<8x14xf32>
    %65 = vector.shape_cast %62 : vector<8x14xf32> to vector<1x8x1x14xf32>
    tpu.vector_store %arg4[%c0_62, %c0_63, %c9, %c0_64], %65 {strides = array<i32>} : memref<1x8x14x14xf32, #tpu.memory_space<vmem>>, vector<1x8x1x14xf32>,
    %66 = vector.extract_strided_slice %25 {offsets = [0, 160], sizes = [8, 14], strides = [1, 1]} : vector<8x224xf32> to vector<8x14xf32>
    %c0_65 = arith.constant 0 : index
    %c0_66 = arith.constant 0 : index
    %c10 = arith.constant 10 : index
    %c0_67 = arith.constant 0 : index
    %67 = vector.load %arg4[%c0_65, %c0_66, %c10, %c0_67] : memref<1x8x14x14xf32, #tpu.memory_space<vmem>>, vector<1x8x1x14xf32>
    %68 = vector.shape_cast %67 : vector<1x8x1x14xf32> to vector<8x14xf32>
    %69 = vector.shape_cast %66 : vector<8x14xf32> to vector<1x8x1x14xf32>
    tpu.vector_store %arg4[%c0_65, %c0_66, %c10, %c0_67], %69 {strides = array<i32>} : memref<1x8x14x14xf32, #tpu.memory_space<vmem>>, vector<1x8x1x14xf32>,
    %70 = vector.extract_strided_slice %25 {offsets = [0, 176], sizes = [8, 14], strides = [1, 1]} : vector<8x224xf32> to vector<8x14xf32>
    %c0_68 = arith.constant 0 : index
    %c0_69 = arith.constant 0 : index
    %c11 = arith.constant 11 : index
    %c0_70 = arith.constant 0 : index
    %71 = vector.load %arg4[%c0_68, %c0_69, %c11, %c0_70] : memref<1x8x14x14xf32, #tpu.memory_space<vmem>>, vector<1x8x1x14xf32>
    %72 = vector.shape_cast %71 : vector<1x8x1x14xf32> to vector<8x14xf32>
    %73 = vector.shape_cast %70 : vector<8x14xf32> to vector<1x8x1x14xf32>
    tpu.vector_store %arg4[%c0_68, %c0_69, %c11, %c0_70], %73 {strides = array<i32>} : memref<1x8x14x14xf32, #tpu.memory_space<vmem>>, vector<1x8x1x14xf32>,
    %74 = vector.extract_strided_slice %25 {offsets = [0, 192], sizes = [8, 14], strides = [1, 1]} : vector<8x224xf32> to vector<8x14xf32>
    %c0_71 = arith.constant 0 : index
    %c0_72 = arith.constant 0 : index
    %c12 = arith.constant 12 : index
    %c0_73 = arith.constant 0 : index
    %75 = vector.load %arg4[%c0_71, %c0_72, %c12, %c0_73] : memref<1x8x14x14xf32, #tpu.memory_space<vmem>>, vector<1x8x1x14xf32>
    %76 = vector.shape_cast %75 : vector<1x8x1x14xf32> to vector<8x14xf32>
    %77 = vector.shape_cast %74 : vector<8x14xf32> to vector<1x8x1x14xf32>
    tpu.vector_store %arg4[%c0_71, %c0_72, %c12, %c0_73], %77 {strides = array<i32>} : memref<1x8x14x14xf32, #tpu.memory_space<vmem>>, vector<1x8x1x14xf32>,
    %78 = vector.extract_strided_slice %25 {offsets = [0, 208], sizes = [8, 14], strides = [1, 1]} : vector<8x224xf32> to vector<8x14xf32>
    %c0_74 = arith.constant 0 : index
    %c0_75 = arith.constant 0 : index
    %c13 = arith.constant 13 : index
    %c0_76 = arith.constant 0 : index
    %79 = vector.load %arg4[%c0_74, %c0_75, %c13, %c0_76] : memref<1x8x14x14xf32, #tpu.memory_space<vmem>>, vector<1x8x1x14xf32>
    %80 = vector.shape_cast %79 : vector<1x8x1x14xf32> to vector<8x14xf32>
    %81 = vector.shape_cast %78 : vector<8x14xf32> to vector<1x8x1x14xf32>
    tpu.vector_store %arg4[%c0_74, %c0_75, %c13, %c0_76], %81 {strides = array<i32>} : memref<1x8x14x14xf32, #tpu.memory_space<vmem>>, vector<1x8x1x14xf32>,
    return
  }
  func.func @transform_0(%arg0: i32) -> (i32, i32, i32, i32) {
    %c0_i32 = arith.constant 0 : i32
    %c0_i32_0 = arith.constant 0 : i32
    %c0_i32_1 = arith.constant 0 : i32
    %c0_i32_2 = arith.constant 0 : i32
    return %arg0, %c0_i32, %c0_i32_0, %c0_i32_1 : i32, i32, i32, i32
  }
  func.func @transform_1(%arg0: i32) -> (i32, i32) {
    %c0_i32 = arith.constant 0 : i32
    %c0_i32_0 = arith.constant 0 : i32
    %c0_i32_1 = arith.constant 0 : i32
    return %c0_i32, %c0_i32_0 : i32, i32
  }
  func.func @transform_2(%arg0: i32) -> (i32, i32) {
    %c0_i32 = arith.constant 0 : i32
    %c0_i32_0 = arith.constant 0 : i32
    %c0_i32_1 = arith.constant 0 : i32
    return %c0_i32, %c0_i32_0 : i32, i32
  }
  func.func @transform_3(%arg0: i32) -> (i32, i32, i32, i32) {
    %c0_i32 = arith.constant 0 : i32
    %c0_i32_0 = arith.constant 0 : i32
    %c0_i32_1 = arith.constant 0 : i32
    %c0_i32_2 = arith.constant 0 : i32
    return %arg0, %c0_i32, %c0_i32_0, %c0_i32_1 : i32, i32, i32, i32
  }
}

</mosaic_0001>

<bundles_post_ra>
// kernel: tpu_custom_call.1
= control target key start
LH: loop header
LB: loop body
LE: loop exit
PB: predicated region body
PF: predicated region fallthrough
CT: control target
= control target key end

     0   :  { %8 = vsyncpa [#allocation3], 0  ;;  %s1718_s0 = inlined_call_operand.hbm [shape: bf16[2,1,8,272], index: 0, kind: input, shape index: {}]   ;;  %s1719_s1 = inlined_call_operand.vmem [shape: bf16[8,72], index: 1, kind: input, shape index: {}]   ;;  %s1720_s2 = inlined_call_operand.vmem [shape: f32[8,1], index: 2, kind: input, shape index: {}]   ;;  %s1721_s3 = inlined_call_operand.vmem [shape: f32[2,8,14,14], index: 3, kind: output, shape index: {}]  }
   0x1   :  { %10 = vsyncpa [#allocation3 + $0x1], 0  ;;  %s1173_s12 = smov 0   ;;  %s1175_s13 = smov 0  }
   0x2   :  { %s1177_s14 = smov 0   ;;  %s1179_s15 = smov 0  }
   0x3 LB: > { %s1192_s16 = sadd.s32 4294967295, %s1135_s15   ;;  %s1195_s17 = sadd.s32 1, %s1135_s15   ;;  %s1135_s15 = sphi %s1179_s15, %s1728_s15   ;;  %s1131_s14 = sphi %s1177_s14, %s1727_s14   ;;  %s1127_s13 = sphi %s1175_s13, %s1726_s13   ;;  %s1123_s12 = sphi %s1173_s12, %s1725_s12  }
   0x4   : > { %s20_s18 = ssub.s32 %s1135_s15, %s1195_s17  ;;  %s23_s19 = sadd.s32 1, %s1131_s14 }
   0x5   : > { %p21_p0 = scmp.eq.s32.totalorder %s20_s18, 0  ;;  %p30_p1 = scmp.ne.s32.totalorder %s1131_s14, %s1127_s13 }
   0x6   : > { %p31_p2 = scmp.eq.s32.totalorder %s1135_s15, 0  ;;  %p36_p3 = scmp.ne.s32.totalorder %s1127_s13, %s1123_s12 }
   0x7   : > { %s1205_s20 = scalar_select %p21_p0, %s1131_s14, %s23_s19  }
   0x8   : > { %p32_p4 = por %p31_p2, %p30_p1  ;;  %p37_p5 = scmp.eq.s32.totalorder %s1192_s16, 0 }
   0x9   : > { %p1019_p6 = scmp.lt.s32.totalorder %s1135_s15, 2  ;;  %s134_s22 = sand.u32 1, %s1131_s14  }
   0xa   : > { %p1209_p7 = por %p37_p5, %p36_p3  ;;  %s1010_s23 = smul.u32 12, %s134_s22 }
   0xb   : > { %s1011_s24 = smul.u32 192, %s1135_s15  ;;  %p1215_p8 = pnand %p1019_p6, %p32_p4 }
   0xc   : > { %s138_s29 = scalar_lea.vmem [#allocation2], %s1010_s23  ;;  %s135_s4 = scalar_lea.sflag [#allocation3], %s134_s22 }
   0xd   : > { %s1223_s28 = scalar_lea.hbm %s1718_s0, %s1011_s24  ;;  %s146_s30 = sshll.u32 %s138_s29, 4  ;;  %s1225_s30 = int_to_ptr.vmem [resolvable:$true] %s146_s30 }
   0xe   : > { %s1071_s5 = scalar_lea.hbm %s1223_s28, 192  ;;  %p1073_p11 = pneg %p1215_p8 }
   0xf   : > { %p1072_p10 = scmp.ne.s32.totalorder %s1223_s28, %s1071_s5  ;;  %s1076_s8 = scalar_lea.hbm %s1718_s0, 384 }
  0x10   : > { %p1077_p0 = scmp.lt.u32.totalorder %s1223_s28, %s1718_s0  ;;  %p1078_p1 = scmp.lt.u32.totalorder %s1076_s8, %s1071_s5 }
  0x11   : > { %p1074_p12 = pnand %p1073_p11, %p1072_p10  ;;  %p1080_p3 = scmp.lt.u32.totalorder %s1071_s5, %s1223_s28 }
  0x12   : > { %p1079_p2 = por %p1078_p1, %p1077_p0 }
  0x13   : > { %p1075_p13 = pneg %p1074_p12 }
  0x14   : > { %p1081_p4 = por %p1080_p3, %p1079_p2 }
  0x16   : > { %p1082_p5 = pnand %p1081_p4, %p1075_p13 }
  0x18   : > { %1085 = shalt.err (!%p1082_p5)
}
  0x19   : > { %s1086_s11 = scalar_lea.vmem %s1225_s30, 192  ;;  %s1137_s12 = smov [#allocation2]  }
  0x1a   : > { %p1087_p6 = scmp.ne.s32.totalorder %s1225_s30, %s1086_s11  ;;  %s1091_s18 = sshll.u32 %s1137_s12, 4  ;;  %s1092_s18 = int_to_ptr.vmem [resolvable:$false] %s1091_s18 }
  0x1b   : > { %s1093_s19 = scalar_lea.vmem %s1092_s18, 384  ;;  %p1094_p9 = scmp.lt.s32.totalorder %s1225_s30, %s1092_s18 }
  0x1c   : > { %p1089_p10 = pnand %p1087_p6, %p1073_p11  ;;  %p1095_p0 = scmp.lt.s32.totalorder %s1093_s19, %s1086_s11 }
  0x1e   : > { %p1090_p12 = pneg %p1089_p10  ;;  %p1096_p1 = por %p1095_p0, %p1094_p9 }
  0x20   : > { %p1097_p2 = pnand %p1096_p1, %p1090_p12 }
  0x22   : > { %1100 = shalt.err (!%p1097_p2)
}
  0x23   : > { %1018 = dma.hbm_to_vmem [thread:$0]  (!%p1215_p8), %s1223_s28, 192, %s1225_s30, %s135_s4  }
  0x24   : > { %p151_p13 = scmp.lt.s32.totalorder %s1135_s15, 3  ;;  %p1724_p3 = scmp.ge.s32.totalorder %s1135_s15, 1 }
  0x26   : > { %p152_p11 = pnand %p1724_p3, %p151_p13 }
  0x27   : > { %s157_s22 = sand.u32 (!%p152_p11), 1, %s1127_s13  }
  0x28   : > { %155 = sbr.rel (%p152_p11) target bundleno = 735 (0x2df), region = 32  ;;  %s158_s24 = scalar_lea.sflag (!%p152_p11), [#allocation3], %s157_s22 }
  0x29   : > { %s1012_s23 = smul.u32 (!%p152_p11), 12, %s157_s22 }
  0x2b   : > { %s161_s26 = scalar_lea.vmem (!%p152_p11), [#allocation2], %s1012_s23 }
  0x2f   : > { %1118 = dma.done.wait (%p1209_p7), %s158_s24, 192  }
  0x30   : > { %1120 = vsyncadd (%p1209_p7), %s158_s24, 4294967104  ;;  %v190_v0 = vld [vmem:[%s161_s26] sm:$0xff]  ;;  %s1138_s25 = smov 126   ;;  %s1139_s27 = smov 127   ;;  %v1070_v3 = vld [vmem:[%s161_s26 + $0x8] ss:$0 sps:$4 sm:$0xff]   ;;  %v352_v46 = vlaneseq }
  0x31   : > { %v1002_v1 = vcombine.low %v190_v0, %v190_v0  ;;  %v1003_v2 = vcombine.high %v190_v0, %v190_v0  ;;  %s1140_s15 = smov 112   ;;  %s1141_s28 = smov 111   ;;  %v1144_v4 = vmov 0   ;;  %v288_v5 = vld [vmem:[%s1720_s2] sm:$0xff]  ;;  %vm254_vm0 = vcmask 1043456  }
  0x32   : > { %s1142_s29 = smov 110   ;;  %s1143_s21 = smov 95   ;;  %336 = vmatprep.mubr.bf16.mxu0 %v1144_v4  ;;  %1067 = vset.pattern.permute.xlu0 %v1144_v4  ;;  %vm201_vm1 = vcmask 1039360   ;;  %vm207_vm2 = vcmask 1031168   ;;  %vm213_vm3 = vcmask 916480   ;;  %vm219_vm4 = vcmask 908288  }
  0x33   : > { %203 = vrot.lane.b32.xlu1 %v1002_v1, %s1138_s25  ;;  %197 = vrot.lane.b32.xlu0 %v1002_v1, %s1139_s27  ;;  %s1145_s30 = smov 96   ;;  %s1146_s4 = smov 94   ;;  %vm225_vm5 = vcmask 900096   ;;  %vm242_vm6 = vcmask 777216   ;;  %vm231_vm7 = vcmask 785408   ;;  %vm251_vm8 = vcmask 769024  }
  0x34   : > { %v287_v43 = vld [vmem:[%s1719_s1] sm:$0xf]  ;;  %vm294_vm9 = vcmask 588800   ;;  %v1147_v44 = vmov 1966171168   ;;  %p184_p7 = scmp.lt.s32.totalorder %s1192_s16, 1 }
  0x35   : > { %v350_v45 = vunpack.c.l.s4 %v1147_v44  ;;  %v353_v48 = vshrl.u32 %v352_v46, 7  ;;  %vm405_vm10 = vcmask 106496   ;;  %s1149_s18 = smov 64   ;;  %s1150_s19 = smov 48  }
  0x36   : > { %s1730_s16 = smov (!%p184_p7, %s1192_s16), 1  ;;  %s1151_s22 = smov 32  }
  0x37   : > { %205 = vrot.lane.b32.xlu1 %v1003_v2, %s1138_s25  ;;  %199 = vrot.lane.b32.xlu0 %v1003_v2, %s1139_s27  ;;  %v351_v47 = vunpack.c.0.s8 %v350_v45  ;;  %s1009_s9 = sshll.u32 %s1730_s16, 7  ;;  %v1287_v61 = vsub.s32 0, %v353_v48  ;;  %s1148_s16 = smov 80  }
  0x38   : > { %s1285_s12 = scalar_lea.vmem %s1721_s3, %s1009_s9  ;;  %s1152_s23 = smov 16  }
  0x39   : > { %v354_v51 = vsub.s32 %v351_v47, %v353_v48 }
  0x3b   : > { %211 = vrot.lane.b32.xlu1 %v1003_v2, %s1140_s15  ;;  %209 = vrot.lane.b32.xlu0 %v1002_v1, %s1140_s15 }
  0x3f   : > { %217 = vrot.lane.b32.xlu1 %v1003_v2, %s1141_s28  ;;  %215 = vrot.lane.b32.xlu0 %v1002_v1, %s1141_s28 }
  0x43   : > { %223 = vrot.lane.b32.xlu1 %v1003_v2, %s1142_s29  ;;  %221 = vrot.lane.b32.xlu0 %v1002_v1, %s1142_s29 }
  0x47   : > { %240 = vrot.lane.b32.xlu1 %v1070_v3, %s1143_s21  ;;  %238 = vrot.lane.b32.xlu0 %v1003_v2, %s1143_s21 }
  0x4b   : > { %229 = vrot.lane.b32.xlu1 %v1003_v2, %s1145_s30  ;;  %227 = vrot.lane.b32.xlu0 %v1002_v1, %s1145_s30 }
  0x4f   : > { %245 = vrot.lane.b32.xlu1 %v1002_v1, %s1146_s4  ;;  %236 = vrot.lane.b32.xlu0 %v1002_v1, %s1143_s21 }
  0x53   : > { %249 = vrot.lane.b32.xlu1 %v1070_v3, %s1146_s4  ;;  %247 = vrot.lane.b32.xlu0 %v1003_v2, %s1146_s4 }
  0x57   : > { %291 = vperm.xlu0 %1067, %v288_v5  }
  0xa5   : > { %v204_v6 = vpop.permute.xlu1 %203  ;;  %v198_v7 = vpop.permute.xlu0 %197 }
  0xa9   : > { %v206_v8 = vpop.permute.xlu1 %205  ;;  %v200_v9 = vpop.permute.xlu0 %199 }
  0xaa   : > { %v261_v10 = vsel %vm254_vm0, %v1003_v2, %v200_v9  ;;  %v202_v11 = vsel %vm201_vm1, %v198_v7, %v200_v9  ;;  %v208_v15 = vsel %vm207_vm2, %v204_v6, %v206_v8 }
  0xab   : > { %304 = vmatprep.subr.bf16.mxu0 %v261_v10  ;;  %v257_v12 = vsel %vm254_vm0, %v1002_v1, %v202_v11 }
  0xac   : > { %305 = vmatpush1.bf16.msra.mxu0 %v257_v12 }
  0xad   : > { %v212_v13 = vpop.permute.xlu1 %211  ;;  %v210_v14 = vpop.permute.xlu0 %209 }
  0xae   : > { %v214_v16 = vsel %vm213_vm3, %v210_v14, %v212_v13  ;;  %v269_v17 = vsel %vm254_vm0, %v206_v8, %v212_v13 }
  0xaf   : > { %306 = vmatprep.subr.bf16.mxu0 %v269_v17  ;;  %v265_v18 = vsel %vm254_vm0, %v208_v15, %v214_v16 }
  0xb0   : > { %307 = vmatpush1.bf16.msra.mxu0 %v265_v18 }
  0xb1   : > { %v218_v19 = vpop.permute.xlu1 %217  ;;  %v216_v20 = vpop.permute.xlu0 %215 }
  0xb2   : > { %v220_v23 = vsel %vm219_vm4, %v216_v20, %v218_v19 }
  0xb5   : > { %v224_v21 = vpop.permute.xlu1 %223  ;;  %v222_v22 = vpop.permute.xlu0 %221 }
  0xb6   : > { %v226_v24 = vsel %vm225_vm5, %v222_v22, %v224_v21  ;;  %v277_v25 = vsel %vm254_vm0, %v218_v19, %v224_v21 }
  0xb7   : > { %308 = vmatprep.subr.bf16.mxu0 %v277_v25  ;;  %v273_v26 = vsel %vm254_vm0, %v220_v23, %v226_v24 }
  0xb8   : > { %309 = vmatpush1.bf16.msra.mxu0 %v273_v26 }
  0xb9   : > { %v241_v27 = vpop.permute.xlu1 %240  ;;  %v239_v28 = vpop.permute.xlu0 %238 }
  0xba   : > { %v244_v29 = vsel %vm242_vm6, %v239_v28, %v241_v27 }
  0xbd   : > { %v230_v30 = vpop.permute.xlu1 %229  ;;  %v228_v31 = vpop.permute.xlu0 %227 }
  0xbe   : > { %v285_v32 = vsel %vm254_vm0, %v230_v30, %v244_v29  ;;  %v232_v35 = vsel %vm231_vm7, %v228_v31, %v230_v30 }
  0xbf   : > { %310 = vmatprep.subr.bf16.mxu0 %v285_v32 }
  0xc1   : > { %v246_v33 = vpop.permute.xlu1 %245  ;;  %v237_v34 = vpop.permute.xlu0 %236 }
  0xc2   : > { %v243_v36 = vsel %vm242_vm6, %v237_v34, %v239_v28 }
  0xc3   : > { %v281_v37 = vsel %vm254_vm0, %v232_v35, %v243_v36 }
  0xc4   : > { %311 = vmatpush1.bf16.msra.mxu0 %v281_v37 }
  0xc5   : > { %v250_v38 = vpop.permute.xlu1 %249  ;;  %v248_v39 = vpop.permute.xlu0 %247 }
  0xc6   : > { %v252_v40 = vsel %vm251_vm8, %v246_v33, %v248_v39  ;;  %v253_v41 = vsel %vm251_vm8, %v248_v39, %v250_v38 }
  0xc7   : > { %1005 = vmatprep.subr.msk.bf16.mxu0 %vm254_vm0, %v253_v41  ;;  %v299_v42 = vsel %vm254_vm0, %v252_v40, 0 }
  0xc8   : > { %313 = vmatpush1.bf16.msra.mxu0 %v299_v42 }
  0xcb   : > { %1006 = vmatmul.mubr.msk.bf16.vlgmr.msra.gmra.mrb[0].mxu0 %vm294_vm9, %v287_v43 }
  0xd6   : > { %v292_v49 = vpop.permute.xlu0 %291 }
 0x19e   : > { %v338_v50 = vpop.f32.mrb[0].mxu0 }
 0x19f   : > { %v339_v52 = vadd.f32 %v338_v50, %v292_v49  ;;  %v340_v53 = vpop.f32.mrb[1].mxu0 }
 0x1a0   : > { %v341_v54 = vadd.f32 %v340_v53, %v292_v49  ;;  %v342_v55 = vpop.f32.mrb[2].mxu0 }
 0x1a1   : > { %v345_v56 = vmax.f32 %v339_v52, 0.0  ;;  %v343_v57 = vpop.f32.mrb[3].mxu0 }
 0x1a2   : > { %v346_v58 = vmax.f32 %v341_v54, 0.0 }
 0x1a3   : > { %v348_v59 = vcombine.high %v345_v56, %v345_v56  ;;  %v355_v60 = vrot.slane %v345_v56, %v354_v51 }
 0x1a4   : > { %v671_v62 = vcombine.high %v346_v58, %v346_v58  ;;  %v678_v63 = vrot.slane %v346_v58, %v354_v51 }
 0x1a5   : > { %v362_v0 = vrot.slane %v348_v59, %v354_v51  ;;  %v363_v1 = vcombine.high %v355_v60, %v355_v60  ;;  %v371_v2 = vrot.slane %v355_v60, %v354_v51 }
 0x1a6   : > { %v685_v3 = vrot.slane %v671_v62, %v354_v51  ;;  %v686_v4 = vcombine.high %v678_v63, %v678_v63  ;;  %v694_v5 = vrot.slane %v678_v63, %v354_v51 }
 0x1a7   : > { %v364_v6 = vcombine.high %v362_v0, %v362_v0  ;;  %v1289_v7 = vrot.slane %v362_v0, %v354_v51  ;;  %v385_v8 = vrot.slane %v363_v1, %v354_v51  ;;  %v1291_v9 = vcombine.high %v371_v2, %v371_v2  ;;  %406 = vst.msk [vmem:[%s1285_s12] sm:$0x1] %vm405_vm10, %v371_v2 }
 0x1a8   : > { %v417_v10 = vrot.slane %v371_v2, %v1287_v61  ;;  %v687_v11 = vcombine.high %v685_v3, %v685_v3  ;;  %v701_v12 = vrot.slane %v685_v3, %v354_v51  ;;  %v708_v13 = vrot.slane %v686_v4, %v354_v51  ;;  %728 = vst.msk [vmem:[%s1285_s12 + $0x8] sm:$0x1] %vm405_vm10, %v694_v5 }
 0x1a9   : > { %v1298_v14 = vrot.slane %v364_v6, %v354_v51  ;;  %v394_v15 = vcombine.high %v1289_v7, %v1289_v7  ;;  %v1302_v16 = vcombine.high %v385_v8, %v385_v8  ;;  %407 = vst.msk [vmem:[%s1285_s12 + $0x10] sm:$0x1] %vm405_vm10, %v385_v8  ;;  %408 = vst.msk [vmem:[%s1285_s12 + $0x20] sm:$0x1] %vm405_vm10, %v1291_v9 }
 0x1aa   : > { %410 = vst.msk [vmem:[%s1285_s12 + $0x40] sm:$0x1] %vm405_vm10, %v1289_v7  ;;  %v715_v17 = vrot.slane %v687_v11, %v354_v51  ;;  %v716_v18 = vcombine.high %v694_v5, %v694_v5  ;;  %729 = vst.msk [vmem:[%s1285_s12 + $0x18] sm:$0x1] %vm405_vm10, %v708_v13  ;;  %478 = vrot.lane.b32.xlu0 %v417_v10, %s1145_s30  ;;  %446 = vrot.lane.b32.xlu1 %v417_v10, %s1140_s15 }
 0x1ab   : > { %732 = vst.msk [vmem:[%s1285_s12 + $0x48] sm:$0x1] %vm405_vm10, %v701_v12  ;;  %v396_v19 = vcombine.high %v1298_v14, %v1298_v14  ;;  %409 = vst.msk [vmem:[%s1285_s12 + $0x30] sm:$0x1] %vm405_vm10, %v1302_v16  ;;  %v1328_v20 = vrot.slane %v394_v15, %v1287_v61  ;;  %v717_v21 = vcombine.high %v701_v12, %v701_v12 }
 0x1ac   : > { %411 = vst.msk [vmem:[%s1285_s12 + $0x50] sm:$0x1] %vm405_vm10, %v1298_v14  ;;  %412 = vst.msk [vmem:[%s1285_s12 + $0x60] sm:$0x1] %vm405_vm10, %v394_v15  ;;  %v718_v22 = vcombine.high %v708_v13, %v708_v13  ;;  %v719_v23 = vcombine.high %v715_v17, %v715_v17  ;;  %v421_v24 = vrot.slane %v385_v8, %v1287_v61 }
 0x1ad   : > { %730 = vst.msk [vmem:[%s1285_s12 + $0x28] sm:$0x1] %vm405_vm10, %v716_v18  ;;  %733 = vst.msk [vmem:[%s1285_s12 + $0x58] sm:$0x1] %vm405_vm10, %v715_v17  ;;  %v1339_v25 = vrot.slane %v396_v19, %v1287_v61  ;;  %v1342_v26 = vrot.slane %v716_v18, %v1287_v61  ;;  %v1345_v27 = vrot.slane %v701_v12, %v1287_v61 }
 0x1ae   : > { %413 = vst.msk [vmem:[%s1285_s12 + $0x70] sm:$0x1] %vm405_vm10, %v396_v19  ;;  %731 = vst.msk [vmem:[%s1285_s12 + $0x38] sm:$0x1] %vm405_vm10, %v718_v22  ;;  %510 = vrot.lane.b32.xlu0 %v417_v10, %s1148_s16  ;;  %v1355_v28 = vrot.slane %v718_v22, %v1287_v61  ;;  %v1358_v29 = vrot.slane %v715_v17, %v1287_v61  ;;  %v1361_v30 = vrot.slane %v717_v21, %v1287_v61 }
 0x1af   : > { %734 = vst.msk [vmem:[%s1285_s12 + $0x68] sm:$0x1] %vm405_vm10, %v717_v21  ;;  %735 = vst.msk [vmem:[%s1285_s12 + $0x78] sm:$0x1] %vm405_vm10, %v719_v23  ;;  %v1364_v31 = vrot.slane %v719_v23, %v1287_v61  ;;  %448 = vrot.lane.b32.xlu1 %v421_v24, %s1140_s15  ;;  %v739_v32 = vrot.slane %v694_v5, %v1287_v61  ;;  %v743_v33 = vrot.slane %v708_v13, %v1287_v61 }
 0x1b0   : > { %v425_v34 = vrot.slane %v1291_v9, %v1287_v61  ;;  %v433_v35 = vrot.slane %v1289_v7, %v1287_v61  ;;  %v429_v36 = vrot.slane %v1302_v16, %v1287_v61  ;;  %v437_v37 = vrot.slane %v1298_v14, %v1287_v61 }
 0x1b2   : > { %542 = vrot.lane.b32.xlu0 %v417_v10, %s1149_s18 }
 0x1b3   : > { %480 = vrot.lane.b32.xlu1 %v421_v24, %s1145_s30 }
 0x1b6   : > { %574 = vrot.lane.b32.xlu0 %v417_v10, %s1150_s19 }
 0x1b7   : > { %512 = vrot.lane.b32.xlu1 %v421_v24, %s1148_s16 }
 0x1ba   : > { %606 = vrot.lane.b32.xlu0 %v417_v10, %s1151_s22 }
 0x1bb   : > { %544 = vrot.lane.b32.xlu1 %v421_v24, %s1149_s18 }
 0x1be   : > { %638 = vrot.lane.b32.xlu0 %v417_v10, %s1152_s23 }
 0x1bf   : > { %576 = vrot.lane.b32.xlu1 %v421_v24, %s1150_s19 }
 0x1c2   : > { %768 = vrot.lane.b32.xlu0 %v739_v32, %s1140_s15 }
 0x1c3   : > { %608 = vrot.lane.b32.xlu1 %v421_v24, %s1151_s22 }
 0x1c6   : > { %800 = vrot.lane.b32.xlu0 %v739_v32, %s1145_s30 }
 0x1c7   : > { %640 = vrot.lane.b32.xlu1 %v421_v24, %s1152_s23 }
 0x1ca   : > { %832 = vrot.lane.b32.xlu0 %v739_v32, %s1148_s16 }
 0x1cb   : > { %770 = vrot.lane.b32.xlu1 %v743_v33, %s1140_s15 }
 0x1ce   : > { %864 = vrot.lane.b32.xlu0 %v739_v32, %s1149_s18 }
 0x1cf   : > { %802 = vrot.lane.b32.xlu1 %v743_v33, %s1145_s30 }
 0x1d2   : > { %896 = vrot.lane.b32.xlu0 %v739_v32, %s1150_s19 }
 0x1d3   : > { %834 = vrot.lane.b32.xlu1 %v743_v33, %s1148_s16 }
 0x1d6   : > { %450 = vrot.lane.b32.xlu0 %v425_v34, %s1140_s15 }
 0x1d7   : > { %866 = vrot.lane.b32.xlu1 %v743_v33, %s1149_s18 }
 0x1da   : > { %454 = vrot.lane.b32.xlu0 %v433_v35, %s1140_s15 }
 0x1db   : > { %898 = vrot.lane.b32.xlu1 %v743_v33, %s1150_s19 }
 0x1de   : > { %482 = vrot.lane.b32.xlu0 %v425_v34, %s1145_s30 }
 0x1df   : > { %452 = vrot.lane.b32.xlu1 %v429_v36, %s1140_s15 }
 0x1e2   : > { %486 = vrot.lane.b32.xlu0 %v433_v35, %s1145_s30 }
 0x1e3   : > { %456 = vrot.lane.b32.xlu1 %v437_v37, %s1140_s15 }
 0x1e6   : > { %514 = vrot.lane.b32.xlu0 %v425_v34, %s1148_s16 }
 0x1e7   : > { %484 = vrot.lane.b32.xlu1 %v429_v36, %s1145_s30 }
 0x1ea   : > { %518 = vrot.lane.b32.xlu0 %v433_v35, %s1148_s16 }
 0x1eb   : > { %488 = vrot.lane.b32.xlu1 %v437_v37, %s1145_s30 }
 0x1ee   : > { %546 = vrot.lane.b32.xlu0 %v425_v34, %s1149_s18 }
 0x1ef   : > { %516 = vrot.lane.b32.xlu1 %v429_v36, %s1148_s16 }
 0x1f2   : > { %550 = vrot.lane.b32.xlu0 %v433_v35, %s1149_s18 }
 0x1f3   : > { %520 = vrot.lane.b32.xlu1 %v437_v37, %s1148_s16 }
 0x1f6   : > { %578 = vrot.lane.b32.xlu0 %v425_v34, %s1150_s19 }
 0x1f7   : > { %548 = vrot.lane.b32.xlu1 %v429_v36, %s1149_s18 }
 0x1fa   : > { %582 = vrot.lane.b32.xlu0 %v433_v35, %s1150_s19 }
 0x1fb   : > { %552 = vrot.lane.b32.xlu1 %v437_v37, %s1149_s18 }
 0x1fe   : > { %610 = vrot.lane.b32.xlu0 %v425_v34, %s1151_s22 }
 0x1ff   : > { %580 = vrot.lane.b32.xlu1 %v429_v36, %s1150_s19 }
 0x202   : > { %614 = vrot.lane.b32.xlu0 %v433_v35, %s1151_s22 }
 0x203   : > { %584 = vrot.lane.b32.xlu1 %v437_v37, %s1150_s19 }
 0x206   : > { %642 = vrot.lane.b32.xlu0 %v425_v34, %s1152_s23 }
 0x207   : > { %612 = vrot.lane.b32.xlu1 %v429_v36, %s1151_s22 }
 0x20a   : > { %646 = vrot.lane.b32.xlu0 %v433_v35, %s1152_s23 }
 0x20b   : > { %616 = vrot.lane.b32.xlu1 %v437_v37, %s1151_s22 }
 0x20e   : > { %772 = vrot.lane.b32.xlu0 %v1342_v26, %s1140_s15 }
 0x20f   : > { %644 = vrot.lane.b32.xlu1 %v429_v36, %s1152_s23 }
 0x212   : > { %776 = vrot.lane.b32.xlu0 %v1345_v27, %s1140_s15 }
 0x213   : > { %648 = vrot.lane.b32.xlu1 %v437_v37, %s1152_s23 }
 0x216   : > { %804 = vrot.lane.b32.xlu0 %v1342_v26, %s1145_s30 }
 0x217   : > { %774 = vrot.lane.b32.xlu1 %v1355_v28, %s1140_s15 }
 0x21a   : > { %808 = vrot.lane.b32.xlu0 %v1345_v27, %s1145_s30 }
 0x21b   : > { %778 = vrot.lane.b32.xlu1 %v1358_v29, %s1140_s15 }
 0x21c   : > { %v479_v38 = vpop.permute.xlu0 %478  ;;  %v447_v39 = vpop.permute.xlu1 %446 }
 0x21d   : > { %502 = vst.msk [vmem:[%s1285_s12 + $0x2] sm:$0x1] %vm405_vm10, %v479_v38  ;;  %470 = vst.msk [vmem:[%s1285_s12 + $0x1] sm:$0x1] %vm405_vm10, %v447_v39 }
 0x21e   : > { %836 = vrot.lane.b32.xlu0 %v1342_v26, %s1148_s16 }
 0x21f   : > { %806 = vrot.lane.b32.xlu1 %v1355_v28, %s1145_s30 }
 0x220   : > { %v511_v40 = vpop.permute.xlu0 %510 }
 0x221   : > { %534 = vst.msk [vmem:[%s1285_s12 + $0x3] sm:$0x1] %vm405_vm10, %v511_v40  ;;  %v449_v41 = vpop.permute.xlu1 %448 }
 0x222   : > { %471 = vst.msk [vmem:[%s1285_s12 + $0x11] sm:$0x1] %vm405_vm10, %v449_v41  ;;  %840 = vrot.lane.b32.xlu0 %v1345_v27, %s1148_s16 }
 0x223   : > { %810 = vrot.lane.b32.xlu1 %v1358_v29, %s1145_s30 }
 0x224   : > { %v543_v42 = vpop.permute.xlu0 %542 }
 0x225   : > { %566 = vst.msk [vmem:[%s1285_s12 + $0x4] sm:$0x1] %vm405_vm10, %v543_v42  ;;  %v481_v43 = vpop.permute.xlu1 %480 }
 0x226   : > { %503 = vst.msk [vmem:[%s1285_s12 + $0x12] sm:$0x1] %vm405_vm10, %v481_v43  ;;  %868 = vrot.lane.b32.xlu0 %v1342_v26, %s1149_s18 }
 0x227   : > { %838 = vrot.lane.b32.xlu1 %v1355_v28, %s1148_s16 }
 0x228   : > { %v575_v44 = vpop.permute.xlu0 %574 }
 0x229   : > { %598 = vst.msk [vmem:[%s1285_s12 + $0x5] sm:$0x1] %vm405_vm10, %v575_v44  ;;  %v513_v45 = vpop.permute.xlu1 %512 }
 0x22a   : > { %535 = vst.msk [vmem:[%s1285_s12 + $0x13] sm:$0x1] %vm405_vm10, %v513_v45  ;;  %872 = vrot.lane.b32.xlu0 %v1345_v27, %s1149_s18 }
 0x22b   : > { %842 = vrot.lane.b32.xlu1 %v1358_v29, %s1148_s16 }
 0x22c   : > { %v607_v46 = vpop.permute.xlu0 %606 }
 0x22d   : > { %630 = vst.msk [vmem:[%s1285_s12 + $0x6] sm:$0x1] %vm405_vm10, %v607_v46  ;;  %v545_v47 = vpop.permute.xlu1 %544 }
 0x22e   : > { %567 = vst.msk [vmem:[%s1285_s12 + $0x14] sm:$0x1] %vm405_vm10, %v545_v47  ;;  %900 = vrot.lane.b32.xlu0 %v1342_v26, %s1150_s19 }
 0x22f   : > { %870 = vrot.lane.b32.xlu1 %v1355_v28, %s1149_s18 }
 0x230   : > { %v639_v48 = vpop.permute.xlu0 %638 }
 0x231   : > { %662 = vst.msk [vmem:[%s1285_s12 + $0x7] sm:$0x1] %vm405_vm10, %v639_v48  ;;  %v577_v49 = vpop.permute.xlu1 %576 }
 0x232   : > { %599 = vst.msk [vmem:[%s1285_s12 + $0x15] sm:$0x1] %vm405_vm10, %v577_v49  ;;  %904 = vrot.lane.b32.xlu0 %v1345_v27, %s1150_s19 }
 0x233   : > { %874 = vrot.lane.b32.xlu1 %v1358_v29, %s1149_s18 }
 0x234   : > { %v769_v50 = vpop.permute.xlu0 %768 }
 0x235   : > { %792 = vst.msk [vmem:[%s1285_s12 + $0x9] sm:$0x1] %vm405_vm10, %v769_v50  ;;  %v609_v51 = vpop.permute.xlu1 %608 }
 0x236   : > { %631 = vst.msk [vmem:[%s1285_s12 + $0x16] sm:$0x1] %vm405_vm10, %v609_v51  ;;  %458 = vrot.lane.b32.xlu0 %v1328_v20, %s1140_s15 }
 0x237   : > { %902 = vrot.lane.b32.xlu1 %v1355_v28, %s1150_s19 }
 0x238   : > { %v801_v52 = vpop.permute.xlu0 %800 }
 0x239   : > { %824 = vst.msk [vmem:[%s1285_s12 + $0xa] sm:$0x1] %vm405_vm10, %v801_v52  ;;  %v641_v53 = vpop.permute.xlu1 %640 }
 0x23a   : > { %663 = vst.msk [vmem:[%s1285_s12 + $0x17] sm:$0x1] %vm405_vm10, %v641_v53  ;;  %490 = vrot.lane.b32.xlu0 %v1328_v20, %s1145_s30 }
 0x23b   : > { %906 = vrot.lane.b32.xlu1 %v1358_v29, %s1150_s19 }
 0x23c   : > { %v833_v54 = vpop.permute.xlu0 %832 }
 0x23d   : > { %856 = vst.msk [vmem:[%s1285_s12 + $0xb] sm:$0x1] %vm405_vm10, %v833_v54  ;;  %v771_v55 = vpop.permute.xlu1 %770 }
 0x23e   : > { %793 = vst.msk [vmem:[%s1285_s12 + $0x19] sm:$0x1] %vm405_vm10, %v771_v55  ;;  %522 = vrot.lane.b32.xlu0 %v1328_v20, %s1148_s16 }
 0x23f   : > { %460 = vrot.lane.b32.xlu1 %v1339_v25, %s1140_s15 }
 0x240   : > { %v865_v56 = vpop.permute.xlu0 %864 }
 0x241   : > { %888 = vst.msk [vmem:[%s1285_s12 + $0xc] sm:$0x1] %vm405_vm10, %v865_v56  ;;  %v803_v57 = vpop.permute.xlu1 %802 }
 0x242   : > { %825 = vst.msk [vmem:[%s1285_s12 + $0x1a] sm:$0x1] %vm405_vm10, %v803_v57  ;;  %554 = vrot.lane.b32.xlu0 %v1328_v20, %s1149_s18 }
 0x243   : > { %492 = vrot.lane.b32.xlu1 %v1339_v25, %s1145_s30 }
 0x244   : > { %v897_v58 = vpop.permute.xlu0 %896 }
 0x245   : > { %920 = vst.msk [vmem:[%s1285_s12 + $0xd] sm:$0x1] %vm405_vm10, %v897_v58  ;;  %v835_v59 = vpop.permute.xlu1 %834 }
 0x246   : > { %857 = vst.msk [vmem:[%s1285_s12 + $0x1b] sm:$0x1] %vm405_vm10, %v835_v59  ;;  %586 = vrot.lane.b32.xlu0 %v1328_v20, %s1150_s19 }
 0x247   : > { %524 = vrot.lane.b32.xlu1 %v1339_v25, %s1148_s16 }
 0x248   : > { %v451_v60 = vpop.permute.xlu0 %450 }
 0x249   : > { %472 = vst.msk [vmem:[%s1285_s12 + $0x21] sm:$0x1] %vm405_vm10, %v451_v60  ;;  %v867_v61 = vpop.permute.xlu1 %866 }
 0x24a   : > { %889 = vst.msk [vmem:[%s1285_s12 + $0x1c] sm:$0x1] %vm405_vm10, %v867_v61  ;;  %618 = vrot.lane.b32.xlu0 %v1328_v20, %s1151_s22 }
 0x24b   : > { %556 = vrot.lane.b32.xlu1 %v1339_v25, %s1149_s18 }
 0x24c   : > { %v455_v62 = vpop.permute.xlu0 %454 }
 0x24d   : > { %v899_v63 = vpop.permute.xlu1 %898  ;;  %474 = vst.msk [vmem:[%s1285_s12 + $0x41] sm:$0x1] %vm405_vm10, %v455_v62 }
 0x24e   : > { %921 = vst.msk [vmem:[%s1285_s12 + $0x1d] sm:$0x1] %vm405_vm10, %v899_v63  ;;  %650 = vrot.lane.b32.xlu0 %v1328_v20, %s1152_s23 }
 0x24f   : > { %588 = vrot.lane.b32.xlu1 %v1339_v25, %s1150_s19 }
 0x250   : > { %v483_v0 = vpop.permute.xlu0 %482 }
 0x251   : > { %v453_v1 = vpop.permute.xlu1 %452  ;;  %504 = vst.msk [vmem:[%s1285_s12 + $0x22] sm:$0x1] %vm405_vm10, %v483_v0 }
 0x252   : > { %473 = vst.msk [vmem:[%s1285_s12 + $0x31] sm:$0x1] %vm405_vm10, %v453_v1  ;;  %780 = vrot.lane.b32.xlu0 %v1361_v30, %s1140_s15 }
 0x253   : > { %620 = vrot.lane.b32.xlu1 %v1339_v25, %s1151_s22 }
 0x254   : > { %v487_v2 = vpop.permute.xlu0 %486 }
 0x255   : > { %506 = vst.msk [vmem:[%s1285_s12 + $0x42] sm:$0x1] %vm405_vm10, %v487_v2  ;;  %v457_v3 = vpop.permute.xlu1 %456 }
 0x256   : > { %475 = vst.msk [vmem:[%s1285_s12 + $0x51] sm:$0x1] %vm405_vm10, %v457_v3  ;;  %812 = vrot.lane.b32.xlu0 %v1361_v30, %s1145_s30 }
 0x257   : > { %652 = vrot.lane.b32.xlu1 %v1339_v25, %s1152_s23 }
 0x258   : > { %v515_v4 = vpop.permute.xlu0 %514 }
 0x259   : > { %536 = vst.msk [vmem:[%s1285_s12 + $0x23] sm:$0x1] %vm405_vm10, %v515_v4  ;;  %v485_v5 = vpop.permute.xlu1 %484 }
 0x25a   : > { %505 = vst.msk [vmem:[%s1285_s12 + $0x32] sm:$0x1] %vm405_vm10, %v485_v5  ;;  %844 = vrot.lane.b32.xlu0 %v1361_v30, %s1148_s16 }
 0x25b   : > { %782 = vrot.lane.b32.xlu1 %v1364_v31, %s1140_s15 }
 0x25c   : > { %v519_v6 = vpop.permute.xlu0 %518 }
 0x25d   : > { %538 = vst.msk [vmem:[%s1285_s12 + $0x43] sm:$0x1] %vm405_vm10, %v519_v6  ;;  %v489_v7 = vpop.permute.xlu1 %488 }
 0x25e   : > { %507 = vst.msk [vmem:[%s1285_s12 + $0x52] sm:$0x1] %vm405_vm10, %v489_v7  ;;  %876 = vrot.lane.b32.xlu0 %v1361_v30, %s1149_s18 }
 0x25f   : > { %814 = vrot.lane.b32.xlu1 %v1364_v31, %s1145_s30 }
 0x260   : > { %v547_v8 = vpop.permute.xlu0 %546 }
 0x261   : > { %568 = vst.msk [vmem:[%s1285_s12 + $0x24] sm:$0x1] %vm405_vm10, %v547_v8  ;;  %v517_v9 = vpop.permute.xlu1 %516 }
 0x262   : > { %537 = vst.msk [vmem:[%s1285_s12 + $0x33] sm:$0x1] %vm405_vm10, %v517_v9  ;;  %908 = vrot.lane.b32.xlu0 %v1361_v30, %s1150_s19 }
 0x263   : > { %846 = vrot.lane.b32.xlu1 %v1364_v31, %s1148_s16 }
 0x264   : > { %v551_v10 = vpop.permute.xlu0 %550 }
 0x265   : > { %570 = vst.msk [vmem:[%s1285_s12 + $0x44] sm:$0x1] %vm405_vm10, %v551_v10  ;;  %v521_v11 = vpop.permute.xlu1 %520 }
 0x266   : > { %539 = vst.msk [vmem:[%s1285_s12 + $0x53] sm:$0x1] %vm405_vm10, %v521_v11 }
 0x267   : > { %878 = vrot.lane.b32.xlu1 %v1364_v31, %s1149_s18 }
 0x268   : > { %v579_v12 = vpop.permute.xlu0 %578 }
 0x269   : > { %600 = vst.msk [vmem:[%s1285_s12 + $0x25] sm:$0x1] %vm405_vm10, %v579_v12  ;;  %v549_v13 = vpop.permute.xlu1 %548 }
 0x26a   : > { %569 = vst.msk [vmem:[%s1285_s12 + $0x34] sm:$0x1] %vm405_vm10, %v549_v13 }
 0x26b   : > { %910 = vrot.lane.b32.xlu1 %v1364_v31, %s1150_s19 }
 0x26c   : > { %v583_v14 = vpop.permute.xlu0 %582 }
 0x26d   : > { %602 = vst.msk [vmem:[%s1285_s12 + $0x45] sm:$0x1] %vm405_vm10, %v583_v14  ;;  %v553_v15 = vpop.permute.xlu1 %552 }
 0x26e   : > { %571 = vst.msk [vmem:[%s1285_s12 + $0x54] sm:$0x1] %vm405_vm10, %v553_v15 }
 0x270   : > { %v611_v16 = vpop.permute.xlu0 %610 }
 0x271   : > { %632 = vst.msk [vmem:[%s1285_s12 + $0x26] sm:$0x1] %vm405_vm10, %v611_v16  ;;  %v581_v17 = vpop.permute.xlu1 %580 }
 0x272   : > { %601 = vst.msk [vmem:[%s1285_s12 + $0x35] sm:$0x1] %vm405_vm10, %v581_v17 }
 0x274   : > { %v615_v18 = vpop.permute.xlu0 %614 }
 0x275   : > { %634 = vst.msk [vmem:[%s1285_s12 + $0x46] sm:$0x1] %vm405_vm10, %v615_v18  ;;  %v585_v19 = vpop.permute.xlu1 %584 }
 0x276   : > { %603 = vst.msk [vmem:[%s1285_s12 + $0x55] sm:$0x1] %vm405_vm10, %v585_v19 }
 0x278   : > { %v643_v20 = vpop.permute.xlu0 %642 }
 0x279   : > { %664 = vst.msk [vmem:[%s1285_s12 + $0x27] sm:$0x1] %vm405_vm10, %v643_v20  ;;  %v613_v21 = vpop.permute.xlu1 %612 }
 0x27a   : > { %633 = vst.msk [vmem:[%s1285_s12 + $0x36] sm:$0x1] %vm405_vm10, %v613_v21 }
 0x27c   : > { %v647_v22 = vpop.permute.xlu0 %646 }
 0x27d   : > { %666 = vst.msk [vmem:[%s1285_s12 + $0x47] sm:$0x1] %vm405_vm10, %v647_v22  ;;  %v617_v23 = vpop.permute.xlu1 %616 }
 0x27e   : > { %635 = vst.msk [vmem:[%s1285_s12 + $0x56] sm:$0x1] %vm405_vm10, %v617_v23 }
 0x280   : > { %v773_v24 = vpop.permute.xlu0 %772 }
 0x281   : > { %794 = vst.msk [vmem:[%s1285_s12 + $0x29] sm:$0x1] %vm405_vm10, %v773_v24  ;;  %v645_v25 = vpop.permute.xlu1 %644 }
 0x282   : > { %665 = vst.msk [vmem:[%s1285_s12 + $0x37] sm:$0x1] %vm405_vm10, %v645_v25 }
 0x284   : > { %v777_v26 = vpop.permute.xlu0 %776 }
 0x285   : > { %796 = vst.msk [vmem:[%s1285_s12 + $0x49] sm:$0x1] %vm405_vm10, %v777_v26  ;;  %v649_v27 = vpop.permute.xlu1 %648 }
 0x286   : > { %667 = vst.msk [vmem:[%s1285_s12 + $0x57] sm:$0x1] %vm405_vm10, %v649_v27 }
 0x288   : > { %v805_v28 = vpop.permute.xlu0 %804 }
 0x289   : > { %826 = vst.msk [vmem:[%s1285_s12 + $0x2a] sm:$0x1] %vm405_vm10, %v805_v28  ;;  %v775_v29 = vpop.permute.xlu1 %774 }
 0x28a   : > { %795 = vst.msk [vmem:[%s1285_s12 + $0x39] sm:$0x1] %vm405_vm10, %v775_v29 }
 0x28c   : > { %v809_v30 = vpop.permute.xlu0 %808 }
 0x28d   : > { %828 = vst.msk [vmem:[%s1285_s12 + $0x4a] sm:$0x1] %vm405_vm10, %v809_v30  ;;  %v779_v31 = vpop.permute.xlu1 %778 }
 0x28e   : > { %797 = vst.msk [vmem:[%s1285_s12 + $0x59] sm:$0x1] %vm405_vm10, %v779_v31 }
 0x290   : > { %v837_v32 = vpop.permute.xlu0 %836 }
 0x291   : > { %858 = vst.msk [vmem:[%s1285_s12 + $0x2b] sm:$0x1] %vm405_vm10, %v837_v32  ;;  %v807_v33 = vpop.permute.xlu1 %806 }
 0x292   : > { %827 = vst.msk [vmem:[%s1285_s12 + $0x3a] sm:$0x1] %vm405_vm10, %v807_v33 }
 0x294   : > { %v841_v34 = vpop.permute.xlu0 %840 }
 0x295   : > { %860 = vst.msk [vmem:[%s1285_s12 + $0x4b] sm:$0x1] %vm405_vm10, %v841_v34  ;;  %v811_v35 = vpop.permute.xlu1 %810 }
 0x296   : > { %829 = vst.msk [vmem:[%s1285_s12 + $0x5a] sm:$0x1] %vm405_vm10, %v811_v35 }
 0x298   : > { %v869_v36 = vpop.permute.xlu0 %868 }
 0x299   : > { %890 = vst.msk [vmem:[%s1285_s12 + $0x2c] sm:$0x1] %vm405_vm10, %v869_v36  ;;  %v839_v37 = vpop.permute.xlu1 %838 }
 0x29a   : > { %859 = vst.msk [vmem:[%s1285_s12 + $0x3b] sm:$0x1] %vm405_vm10, %v839_v37 }
 0x29c   : > { %v873_v38 = vpop.permute.xlu0 %872 }
 0x29d   : > { %892 = vst.msk [vmem:[%s1285_s12 + $0x4c] sm:$0x1] %vm405_vm10, %v873_v38  ;;  %v843_v39 = vpop.permute.xlu1 %842 }
 0x29e   : > { %861 = vst.msk [vmem:[%s1285_s12 + $0x5b] sm:$0x1] %vm405_vm10, %v843_v39 }
 0x2a0   : > { %v901_v40 = vpop.permute.xlu0 %900 }
 0x2a1   : > { %922 = vst.msk [vmem:[%s1285_s12 + $0x2d] sm:$0x1] %vm405_vm10, %v901_v40  ;;  %v871_v41 = vpop.permute.xlu1 %870 }
 0x2a2   : > { %891 = vst.msk [vmem:[%s1285_s12 + $0x3c] sm:$0x1] %vm405_vm10, %v871_v41 }
 0x2a4   : > { %v905_v42 = vpop.permute.xlu0 %904 }
 0x2a5   : > { %924 = vst.msk [vmem:[%s1285_s12 + $0x4d] sm:$0x1] %vm405_vm10, %v905_v42  ;;  %v875_v43 = vpop.permute.xlu1 %874 }
 0x2a6   : > { %893 = vst.msk [vmem:[%s1285_s12 + $0x5c] sm:$0x1] %vm405_vm10, %v875_v43 }
 0x2a8   : > { %v459_v44 = vpop.permute.xlu0 %458 }
 0x2a9   : > { %476 = vst.msk [vmem:[%s1285_s12 + $0x61] sm:$0x1] %vm405_vm10, %v459_v44  ;;  %v903_v45 = vpop.permute.xlu1 %902 }
 0x2aa   : > { %923 = vst.msk [vmem:[%s1285_s12 + $0x3d] sm:$0x1] %vm405_vm10, %v903_v45 }
 0x2ac   : > { %v491_v46 = vpop.permute.xlu0 %490 }
 0x2ad   : > { %508 = vst.msk [vmem:[%s1285_s12 + $0x62] sm:$0x1] %vm405_vm10, %v491_v46  ;;  %v907_v47 = vpop.permute.xlu1 %906 }
 0x2ae   : > { %925 = vst.msk [vmem:[%s1285_s12 + $0x5d] sm:$0x1] %vm405_vm10, %v907_v47 }
 0x2b0   : > { %v523_v48 = vpop.permute.xlu0 %522 }
 0x2b1   : > { %540 = vst.msk [vmem:[%s1285_s12 + $0x63] sm:$0x1] %vm405_vm10, %v523_v48  ;;  %v461_v49 = vpop.permute.xlu1 %460 }
 0x2b2   : > { %477 = vst.msk [vmem:[%s1285_s12 + $0x71] sm:$0x1] %vm405_vm10, %v461_v49 }
 0x2b4   : > { %v555_v50 = vpop.permute.xlu0 %554 }
 0x2b5   : > { %572 = vst.msk [vmem:[%s1285_s12 + $0x64] sm:$0x1] %vm405_vm10, %v555_v50  ;;  %v493_v51 = vpop.permute.xlu1 %492 }
 0x2b6   : > { %509 = vst.msk [vmem:[%s1285_s12 + $0x72] sm:$0x1] %vm405_vm10, %v493_v51 }
 0x2b8   : > { %v587_v52 = vpop.permute.xlu0 %586 }
 0x2b9   : > { %604 = vst.msk [vmem:[%s1285_s12 + $0x65] sm:$0x1] %vm405_vm10, %v587_v52  ;;  %v525_v53 = vpop.permute.xlu1 %524 }
 0x2ba   : > { %541 = vst.msk [vmem:[%s1285_s12 + $0x73] sm:$0x1] %vm405_vm10, %v525_v53 }
 0x2bc   : > { %v619_v54 = vpop.permute.xlu0 %618 }
 0x2bd   : > { %636 = vst.msk [vmem:[%s1285_s12 + $0x66] sm:$0x1] %vm405_vm10, %v619_v54  ;;  %v557_v55 = vpop.permute.xlu1 %556 }
 0x2be   : > { %573 = vst.msk [vmem:[%s1285_s12 + $0x74] sm:$0x1] %vm405_vm10, %v557_v55 }
 0x2c0   : > { %v651_v56 = vpop.permute.xlu0 %650 }
 0x2c1   : > { %668 = vst.msk [vmem:[%s1285_s12 + $0x67] sm:$0x1] %vm405_vm10, %v651_v56  ;;  %v589_v57 = vpop.permute.xlu1 %588 }
 0x2c2   : > { %605 = vst.msk [vmem:[%s1285_s12 + $0x75] sm:$0x1] %vm405_vm10, %v589_v57 }
 0x2c4   : > { %v781_v58 = vpop.permute.xlu0 %780 }
 0x2c5   : > { %798 = vst.msk [vmem:[%s1285_s12 + $0x69] sm:$0x1] %vm405_vm10, %v781_v58  ;;  %v621_v59 = vpop.permute.xlu1 %620 }
 0x2c6   : > { %637 = vst.msk [vmem:[%s1285_s12 + $0x76] sm:$0x1] %vm405_vm10, %v621_v59 }
 0x2c8   : > { %v813_v60 = vpop.permute.xlu0 %812 }
 0x2c9   : > { %830 = vst.msk [vmem:[%s1285_s12 + $0x6a] sm:$0x1] %vm405_vm10, %v813_v60  ;;  %v653_v61 = vpop.permute.xlu1 %652 }
 0x2ca   : > { %669 = vst.msk [vmem:[%s1285_s12 + $0x77] sm:$0x1] %vm405_vm10, %v653_v61 }
 0x2cc   : > { %v845_v62 = vpop.permute.xlu0 %844 }
 0x2cd   : > { %862 = vst.msk [vmem:[%s1285_s12 + $0x6b] sm:$0x1] %vm405_vm10, %v845_v62  ;;  %v783_v63 = vpop.permute.xlu1 %782 }
 0x2ce   : > { %799 = vst.msk [vmem:[%s1285_s12 + $0x79] sm:$0x1] %vm405_vm10, %v783_v63 }
 0x2d0   : > { %v877_v0 = vpop.permute.xlu0 %876 }
 0x2d1   : > { %894 = vst.msk [vmem:[%s1285_s12 + $0x6c] sm:$0x1] %vm405_vm10, %v877_v0  ;;  %v815_v1 = vpop.permute.xlu1 %814 }
 0x2d2   : > { %831 = vst.msk [vmem:[%s1285_s12 + $0x7a] sm:$0x1] %vm405_vm10, %v815_v1 }
 0x2d4   : > { %v909_v2 = vpop.permute.xlu0 %908 }
 0x2d5   : > { %926 = vst.msk [vmem:[%s1285_s12 + $0x6d] sm:$0x1] %vm405_vm10, %v909_v2  ;;  %v847_v3 = vpop.permute.xlu1 %846 }
 0x2d6   : > { %863 = vst.msk [vmem:[%s1285_s12 + $0x7b] sm:$0x1] %vm405_vm10, %v847_v3 }
 0x2d9   : > { %v879_v4 = vpop.permute.xlu1 %878 }
 0x2da   : > { %895 = vst.msk [vmem:[%s1285_s12 + $0x7c] sm:$0x1] %vm405_vm10, %v879_v4 }
 0x2dd   : > { %v911_v5 = vpop.permute.xlu1 %910 }
 0x2de   : > { %927 = vst.msk [vmem:[%s1285_s12 + $0x7d] sm:$0x1] %vm405_vm10, %v911_v5 }
 0x2df PF: > { %p13_p8 = scmp.ge.s32.totalorder %s1195_s17, 4   ;;  %s1725_s12 = smov %s1127_s13 }
 0x2e0   : > { %s1726_s13 = smov %s1131_s14  ;;  %s1727_s14 = smov %s1205_s20 }
 0x2e1   : > { %s1728_s15 = smov %s1195_s17  ;;  %15 = sbr.rel (!%p13_p8) target bundleno = 3 (0x3), region = 72 }
 0x2e8   :  { %949 = vsyncpa [#allocation3], 1 }
 0x2e9   :  { %951 = vsyncpa [#allocation3 + $0x1], 1 }

</bundles_post_ra>
